<compile_context>
chip_gen: v7x
topology: tpu7x:2x2x1
jax: 0.10.0
libtpu: 0.0.40
codegen_flags: <defaults>
</compile_context>

<pallas_src>
import jax
import jax.numpy as jnp
from jax import lax
from jax.experimental import pallas as pl
from jax.experimental.pallas import tpu as pltpu


# ------------------------------ helpers -----------------------------------

def _round_up(x, m):
    return (x + m - 1) // m * m


def _interp_matrix(n_in, n_out):
    """Interpolation matrix (f32) for bilinear upsample with align_corners=True."""
    if n_in == 1:
        return jnp.ones((n_out, 1), jnp.float32)
    src = jnp.arange(n_out, dtype=jnp.float32) * (n_in - 1) / (n_out - 1)
    lo = jnp.clip(jnp.floor(src).astype(jnp.int32), 0, n_in - 2)
    frac = src - lo.astype(jnp.float32)
    rows = jnp.arange(n_out)
    m = jnp.zeros((n_out, n_in), jnp.float32)
    m = m.at[rows, lo].add(1.0 - frac)
    m = m.at[rows, lo + 1].add(frac)
    return m


# ------------------------------ fused kernel -------------------------------

def _make_fused_kernel(Chor, Ctot, NCOL, offsets):
    def kernel(x1_ref, x2p_ref, upw_ref, kTp_ref, biasp_ref, w9_ref,
               scale_ref, shift_ref, o_ref, xp_ref):
        # --- up path: 1x1 conv (channel matmul) + bilinear x2 upsample
        #     (align_corners=True) + F.pad placement, folded into two matmuls
        #     (the interp matrix already contains the pad placement / zero ring). ---
        t = jnp.dot(upw_ref[...], x1_ref[0],
                    preferred_element_type=jnp.float32)              # (Chor, H1*W1)
        y = jnp.dot(t, kTp_ref[...],
                    preferred_element_type=jnp.float32) + biasp_ref[...]  # (Chor, RPAD)

        # --- channel concat [x2 | up(x1)] into the flattened padded-image scratch.
        #     Both halves already carry their zero pad ring, so every lane is written
        #     and no zero-fill pass is needed.  Only 2 dense full-lane stores. ---
        xp_ref[0:Chor, :] = x2p_ref[0]
        xp_ref[Chor:Ctot, :] = y

        # --- 3x3 conv: build the (9*Ctot, NCOL) stacked-window operand once
        #     (9 shifted slices, 8-sublane-aligned concat) and do ONE MXU matmul
        #     with K = 9*Ctot over the lane-dense flattened image. ---
        stack = jnp.concatenate([xp_ref[:, s:s + NCOL] for s in offsets], axis=0)
        acc = jnp.dot(w9_ref[...], stack, preferred_element_type=jnp.float32)

        # --- folded BatchNorm (eval) + ReLU; channel-major, lane-dense store ---
        o_ref[0] = jnp.maximum(acc * scale_ref[...] + shift_ref[...],
                               0.0).astype(o_ref.dtype)

    return kernel


# ---------------------------- ParametricUp ---------------------------------

@jax.jit
def parametric_up_forward(x1_nchw, x2_nchw, params):
    """ParametricUp.forward with bilinear=True, padding=1, top_pad/left_pad=None."""
    N, Cin, H1, W1 = x1_nchw.shape
    N2, Chor, H2, W2 = x2_nchw.shape
    assert N == N2
    Cout = params["conv_w"].shape[-1]
    Ctot = 2 * Chor
    Ho, Wo = 2 * H1, 2 * W1
    dy, dx = H2 - Ho, W2 - Wo
    # TODO(synk): negative dy/dx (F.pad crop) and padding=0 paths not implemented.
    assert dy >= 0 and dx >= 0
    pad_top, pad_left = dy // 2, dx // 2
    pad_bot, pad_right = dy - pad_top, dx - pad_left

    W2p = W2 + 2                          # conv-padded row width
    HP = H2 + 2                           # conv-padded row count
    NCOL_raw = H2 * W2p                   # flattened output length (incl. junk cols)
    NCOL = _round_up(NCOL_raw, 128)       # lane-dense output extent
    s_max = 2 * W2p + 2                   # largest window shift
    RPAD = _round_up(max(HP * W2p, NCOL + s_max), 128)   # padded-image lane extent
    offsets = tuple(ky * W2p + kx for ky in range(3) for kx in range(3))

    f32 = jnp.float32

    # ---- constants (built once inside the jitted executable) ----------------
    # Bilinear interp as a kron matrix, with the F.pad + conv zero-padding placement
    # folded in: zero columns at every pad position of the flattened padded image.
    r_mat = _interp_matrix(H1, Ho)                       # (Ho, H1)
    c_mat = _interp_matrix(W1, Wo)                       # (Wo, W1)
    kT = jnp.kron(r_mat, c_mat).T.reshape(H1 * W1, Ho, Wo)
    # TODO(synk): separable row/col interp matmuls for production sizes.
    kTp = jnp.pad(kT, ((0, 0), (1 + pad_top, 1 + pad_bot),
                       (1 + pad_left, 1 + pad_right)))   # (H1*W1, HP, W2p)
    kTp = jnp.pad(kTp.reshape(H1 * W1, HP * W2p),
                  ((0, 0), (0, RPAD - HP * W2p)))        # (H1*W1, RPAD)

    placed = jnp.pad(jnp.ones((Ho, Wo), f32),
                     ((1 + pad_top, 1 + pad_bot), (1 + pad_left, 1 + pad_right)))
    placed = jnp.pad(placed.reshape(1, HP * W2p), ((0, 0), (0, RPAD - HP * W2p)))
    biasp = params["up_b"].astype(f32).reshape(Chor, 1) * placed       # (Chor, RPAD)

    upw = params["up_w"].astype(f32).T                                 # (Chor, Cin)

    # 3x3 conv weight -> (Cout, 9*Ctot), tap-major (ky,kx) then channel; matches the
    # stacked-window row order in the kernel.
    w9 = jnp.transpose(params["conv_w"].astype(f32), (3, 0, 1, 2)).reshape(Cout, 9 * Ctot)

    eps = 1e-5
    scale = (params["bn_gamma"] / jnp.sqrt(params["bn_var"] + eps)).astype(f32).reshape(Cout, 1)
    shift = (params["bn_beta"].astype(f32).reshape(Cout, 1)
             - params["bn_mean"].astype(f32).reshape(Cout, 1) * scale)

    # ---- input layout plumbing (cheap XLA ops, fused under jit) -------------
    x1f = x1_nchw.reshape(N, Cin, H1 * W1)
    # skip connection pre-placed into the flattened, zero-ring-padded row layout
    x2p = jnp.pad(x2_nchw, ((0, 0), (0, 0), (1, 1), (1, 1))).reshape(N, Chor, HP * W2p)
    x2p = jnp.pad(x2p, ((0, 0), (0, 0), (0, RPAD - HP * W2p)))

    kernel = _make_fused_kernel(Chor, Ctot, NCOL, offsets)

    out = pl.pallas_call(
        kernel,
        grid=(N,),
        in_specs=[
            pl.BlockSpec((1, Cin, H1 * W1), lambda b: (b, 0, 0)),   # x1 (per batch)
            pl.BlockSpec((1, Chor, RPAD), lambda b: (b, 0, 0)),     # x2, pre-placed
            pl.BlockSpec((Chor, Cin), lambda b: (0, 0)),            # 1x1 conv weight
            pl.BlockSpec((H1 * W1, RPAD), lambda b: (0, 0)),        # interp + placement
            pl.BlockSpec((Chor, RPAD), lambda b: (0, 0)),           # placed 1x1 bias
            pl.BlockSpec((Cout, 9 * Ctot), lambda b: (0, 0)),       # 3x3 conv weights
            pl.BlockSpec((Cout, 1), lambda b: (0, 0)),              # BN scale
            pl.BlockSpec((Cout, 1), lambda b: (0, 0)),              # BN shift
        ],
        out_specs=pl.BlockSpec((1, Cout, NCOL), lambda b: (b, 0, 0)),
        out_shape=jax.ShapeDtypeStruct((N, Cout, NCOL), f32),
        scratch_shapes=[pltpu.VMEM((Ctot, RPAD), f32)],
        compiler_params=pltpu.CompilerParams(
            dimension_semantics=("parallel",)),
    )(x1f, x2p, upw, kTp, biasp, w9, scale, shift)

    # strip the junk columns of the flattened-row layout (output stays NCHW)
    return out[:, :, :NCOL_raw].reshape(N, Cout, H2, W2p)[:, :, :, :W2]


# ----------------------------- reference (plain JAX) ------------------------

def parametric_up_reference(x1_nchw, x2_nchw, params):
    x1 = jnp.transpose(x1_nchw, (0, 2, 3, 1))
    x2 = jnp.transpose(x2_nchw, (0, 2, 3, 1))
    y = jnp.einsum("nhwc,cd->nhwd", x1, params["up_w"]) + params["up_b"]
    n, h, w, c = y.shape
    r_mat = _interp_matrix(h, 2 * h)
    c_mat = _interp_matrix(w, 2 * w)
    y = jnp.einsum("oh,nhwc->nowc", r_mat, y)
    y = jnp.einsum("pw,nowc->nopc", c_mat, y)
    dy = x2.shape[1] - y.shape[1]
    dx = x2.shape[2] - y.shape[2]
    pt, p_left = dy // 2, dx // 2
    y = jnp.pad(y, ((0, 0), (pt, dy - pt), (p_left, dx - p_left), (0, 0)))
    x = jnp.concatenate([x2, y], axis=-1)
    z = lax.conv_general_dilated(x, params["conv_w"], (1, 1), ((1, 1), (1, 1)),
                                 dimension_numbers=("NHWC", "HWIO", "NHWC"))
    eps = 1e-5
    z = (z - params["bn_mean"]) / jnp.sqrt(params["bn_var"] + eps)
    z = z * params["bn_gamma"] + params["bn_beta"]
    z = jnp.maximum(z, 0.0)
    return jnp.transpose(z, (0, 3, 1, 2))


# --------------------------------- main -------------------------------------

if __name__ == "__main__":
    # Module config: in_channels=8, out_channels=8 -> hor_channels = 8 // 2 = 4
    in_ch, out_ch = 8, 8
    hor_ch = in_ch // 2
    N, H1, W1 = 2, 8, 8          # x1 (bottom feature map)
    H2, W2 = 18, 18              # x2 (skip connection), 2*H1=16 -> pad by (1,1)

    key = jax.random.PRNGKey(0)
    k_x1, k_x2, k_w1, k_b1, k_w3, k_g, k_b, k_m, k_v = jax.random.split(key, 9)

    x1 = jax.random.normal(k_x1, (N, in_ch, H1, W1), jnp.float32)
    x2 = jax.random.normal(k_x2, (N, hor_ch, H2, W2), jnp.float32)

    params = {
        # up conv: PyTorch weight (hor, in, 1, 1) -> stored as (in, hor) for matmul
        "up_w": 0.1 * jax.random.normal(k_w1, (in_ch, hor_ch), jnp.float32),
        "up_b": 0.1 * jax.random.normal(k_b1, (hor_ch,), jnp.float32),
        # 3x3 conv: PyTorch weight (out, 2*hor, 3, 3) -> stored as HWIO
        "conv_w": 0.1 * jax.random.normal(k_w3, (3, 3, 2 * hor_ch, out_ch),
                                          jnp.float32),
        # BatchNorm2d (eval / inference semantics: running statistics)
        "bn_gamma": 1.0 + 0.1 * jax.random.normal(k_g, (out_ch,), jnp.float32),
        "bn_beta": 0.1 * jax.random.normal(k_b, (out_ch,), jnp.float32),
        "bn_mean": 0.1 * jax.random.normal(k_m, (out_ch,), jnp.float32),
        "bn_var": 0.5 + jax.random.uniform(k_v, (out_ch,), jnp.float32),
    }

    out = jax.block_until_ready(parametric_up_forward(x1, x2, params))
    ref = jax.block_until_ready(parametric_up_reference(x1, x2, params))

    assert out.shape == (N, out_ch, H2, W2), out.shape
    assert jnp.allclose(out, ref, atol=2e-2, rtol=2e-2), (
        float(jnp.max(jnp.abs(out - ref))))

    print("KERNEL_OK")
</pallas_src>

<mosaic_0001>
module attributes {stable_mosaic.version = 11 : i64} {
  func.func private @main(%arg0: i32) attributes {dimension_semantics = [#tpu.dimension_semantics<core_parallel>], iteration_bounds = array<i64: 2>, tpu.core_type = #tpu.core_type<sc_scalar_subcore>, window_params = []} {
    return
  }
}

module attributes {stable_mosaic.version = 11 : i64} {
  func.func private @main(%arg0: i32) attributes {dimension_semantics = [#tpu.dimension_semantics<core_parallel>], iteration_bounds = array<i64: 2>, tpu.core_type = #tpu.core_type<sc_scalar_subcore>, window_params = []} {
    return
  }
}

module attributes {stable_mosaic.version = 11 : i64} {
  func.func @kernel(%arg0: i32, %arg1: memref<1x8x64xf32, #tpu.memory_space<vmem>>, %arg2: memref<1x4x512xf32, #tpu.memory_space<vmem>>, %arg3: memref<4x8xf32, #tpu.memory_space<vmem>>, %arg4: memref<64x512xf32, #tpu.memory_space<vmem>>, %arg5: memref<4x512xf32, #tpu.memory_space<vmem>>, %arg6: memref<8x72xf32, #tpu.memory_space<vmem>>, %arg7: memref<8x1xf32, #tpu.memory_space<vmem>>, %arg8: memref<8x1xf32, #tpu.memory_space<vmem>>, %arg9: memref<1x8x384xf32, #tpu.memory_space<vmem>>, %arg10: memref<8x512xf32, #tpu.memory_space<vmem>>) attributes {dimension_semantics = [#tpu.dimension_semantics<parallel>], iteration_bounds = array<i64: 2>, scalar_prefetch = 0 : i64, scratch_operands = 1 : i64, tpu.core_type = #tpu.core_type<tc>, window_params = [{transform_indices = @transform_0, window_bounds = array<i64: 1, 8, 64>}, {transform_indices = @transform_1, window_bounds = array<i64: 1, 4, 512>}, {pipeline_mode = #tpu.pipeline_mode<synchronous>, transform_indices = @transform_2, window_bounds = array<i64: 4, 8>}, {pipeline_mode = #tpu.pipeline_mode<synchronous>, transform_indices = @transform_3, window_bounds = array<i64: 64, 512>}, {pipeline_mode = #tpu.pipeline_mode<synchronous>, transform_indices = @transform_4, window_bounds = array<i64: 4, 512>}, {pipeline_mode = #tpu.pipeline_mode<synchronous>, transform_indices = @transform_5, window_bounds = array<i64: 8, 72>}, {pipeline_mode = #tpu.pipeline_mode<synchronous>, transform_indices = @transform_6, window_bounds = array<i64: 8, 1>}, {pipeline_mode = #tpu.pipeline_mode<synchronous>, transform_indices = @transform_7, window_bounds = array<i64: 8, 1>}, {transform_indices = @transform_8, window_bounds = array<i64: 1, 8, 384>}]} {
    %c0 = arith.constant 0 : index
    %c0_0 = arith.constant 0 : index
    %0 = vector.load %arg3[%c0, %c0_0] : memref<4x8xf32, #tpu.memory_space<vmem>>, vector<4x8xf32>
    %c0_1 = arith.constant 0 : index
    %c0_2 = arith.constant 0 : index
    %c0_3 = arith.constant 0 : index
    %1 = vector.load %arg1[%c0_1, %c0_2, %c0_3] : memref<1x8x64xf32, #tpu.memory_space<vmem>>, vector<1x8x64xf32>
    %2 = vector.shape_cast %1 : vector<1x8x64xf32> to vector<8x64xf32>
    %cst = arith.constant dense<0.000000e+00> : vector<4x64xf32>
    %3 = tpu.matmul %0, %2, %cst {dimension_numbers = #tpu.dot_dimension_numbers<[1], [0], [0], [1], [0, 0, 1, 1], [], []>} : vector<4x8xf32>, vector<8x64xf32>, vector<4x64xf32> -> vector<4x64xf32>
    %c0_4 = arith.constant 0 : index
    %c0_5 = arith.constant 0 : index
    %4 = vector.load %arg4[%c0_4, %c0_5] : memref<64x512xf32, #tpu.memory_space<vmem>>, vector<64x512xf32>
    %cst_6 = arith.constant dense<0.000000e+00> : vector<4x512xf32>
    %5 = tpu.matmul %3, %4, %cst_6 {dimension_numbers = #tpu.dot_dimension_numbers<[1], [0], [0], [1], [0, 0, 1, 1], [], []>} : vector<4x64xf32>, vector<64x512xf32>, vector<4x512xf32> -> vector<4x512xf32>
    %c0_7 = arith.constant 0 : index
    %c0_8 = arith.constant 0 : index
    %6 = vector.load %arg5[%c0_7, %c0_8] : memref<4x512xf32, #tpu.memory_space<vmem>>, vector<4x512xf32>
    %7 = arith.addf %5, %6 : vector<4x512xf32>
    %c0_9 = arith.constant 0 : index
    %c0_10 = arith.constant 0 : index
    %c0_11 = arith.constant 0 : index
    %8 = vector.load %arg2[%c0_9, %c0_10, %c0_11] : memref<1x4x512xf32, #tpu.memory_space<vmem>>, vector<1x4x512xf32>
    %9 = vector.shape_cast %8 : vector<1x4x512xf32> to vector<4x512xf32>
    %c0_12 = arith.constant 0 : index
    %c0_13 = arith.constant 0 : index
    %10 = vector.load %arg10[%c0_12, %c0_13] : memref<8x512xf32, #tpu.memory_space<vmem>>, vector<4x512xf32>
    tpu.vector_store %arg10[%c0_12, %c0_13], %9 {strides = array<i32>} : memref<8x512xf32, #tpu.memory_space<vmem>>, vector<4x512xf32>,
    %c4 = arith.constant 4 : index
    %c0_14 = arith.constant 0 : index
    %11 = vector.load %arg10[%c4, %c0_14] : memref<8x512xf32, #tpu.memory_space<vmem>>, vector<4x512xf32>
    tpu.vector_store %arg10[%c4, %c0_14], %7 {strides = array<i32>} : memref<8x512xf32, #tpu.memory_space<vmem>>, vector<4x512xf32>,
    %c0_15 = arith.constant 0 : index
    %c0_16 = arith.constant 0 : index
    %12 = vector.load %arg10[%c0_15, %c0_16] : memref<8x512xf32, #tpu.memory_space<vmem>>, vector<8x384xf32>
    %c0_17 = arith.constant 0 : index
    %c1 = arith.constant 1 : index
    %13 = vector.load %arg10[%c0_17, %c1] : memref<8x512xf32, #tpu.memory_space<vmem>>, vector<8x384xf32>
    %c0_18 = arith.constant 0 : index
    %c2 = arith.constant 2 : index
    %14 = vector.load %arg10[%c0_18, %c2] : memref<8x512xf32, #tpu.memory_space<vmem>>, vector<8x384xf32>
    %c0_19 = arith.constant 0 : index
    %c20 = arith.constant 20 : index
    %15 = vector.load %arg10[%c0_19, %c20] : memref<8x512xf32, #tpu.memory_space<vmem>>, vector<8x384xf32>
    %c0_20 = arith.constant 0 : index
    %c21 = arith.constant 21 : index
    %16 = vector.load %arg10[%c0_20, %c21] : memref<8x512xf32, #tpu.memory_space<vmem>>, vector<8x384xf32>
    %c0_21 = arith.constant 0 : index
    %c22 = arith.constant 22 : index
    %17 = vector.load %arg10[%c0_21, %c22] : memref<8x512xf32, #tpu.memory_space<vmem>>, vector<8x384xf32>
    %c0_22 = arith.constant 0 : index
    %c40 = arith.constant 40 : index
    %18 = vector.load %arg10[%c0_22, %c40] : memref<8x512xf32, #tpu.memory_space<vmem>>, vector<8x384xf32>
    %c0_23 = arith.constant 0 : index
    %c41 = arith.constant 41 : index
    %19 = vector.load %arg10[%c0_23, %c41] : memref<8x512xf32, #tpu.memory_space<vmem>>, vector<8x384xf32>
    %c0_24 = arith.constant 0 : index
    %c42 = arith.constant 42 : index
    %20 = vector.load %arg10[%c0_24, %c42] : memref<8x512xf32, #tpu.memory_space<vmem>>, vector<8x384xf32>
    %21 = tpu.concatenate %12, %13, %14, %15, %16, %17, %18, %19, %20 in 0 : vector<8x384xf32>, vector<8x384xf32>, vector<8x384xf32>, vector<8x384xf32>, vector<8x384xf32>, vector<8x384xf32>, vector<8x384xf32>, vector<8x384xf32>, vector<8x384xf32> -> vector<72x384xf32>
    %c0_25 = arith.constant 0 : index
    %c0_26 = arith.constant 0 : index
    %22 = vector.load %arg6[%c0_25, %c0_26] : memref<8x72xf32, #tpu.memory_space<vmem>>, vector<8x72xf32>
    %cst_27 = arith.constant dense<0.000000e+00> : vector<8x384xf32>
    %23 = tpu.matmul %22, %21, %cst_27 {dimension_numbers = #tpu.dot_dimension_numbers<[1], [0], [0], [1], [0, 0, 1, 1], [], []>} : vector<8x72xf32>, vector<72x384xf32>, vector<8x384xf32> -> vector<8x384xf32>
    %c0_28 = arith.constant 0 : index
    %c0_29 = arith.constant 0 : index
    %24 = vector.load %arg7[%c0_28, %c0_29] : memref<8x1xf32, #tpu.memory_space<vmem>>, vector<8x1xf32>
    %25 = vector.broadcast %24 : vector<8x1xf32> to vector<8x384xf32>
    %26 = arith.mulf %23, %25 : vector<8x384xf32>
    %c0_30 = arith.constant 0 : index
    %c0_31 = arith.constant 0 : index
    %27 = vector.load %arg8[%c0_30, %c0_31] : memref<8x1xf32, #tpu.memory_space<vmem>>, vector<8x1xf32>
    %28 = vector.broadcast %27 : vector<8x1xf32> to vector<8x384xf32>
    %29 = arith.addf %26, %28 : vector<8x384xf32>
    %cst_32 = arith.constant 0.000000e+00 : f32
    %30 = vector.broadcast %cst_32 : f32 to vector<8x384xf32>
    %31 = arith.maximumf %29, %30 : vector<8x384xf32>
    %c0_33 = arith.constant 0 : index
    %c0_34 = arith.constant 0 : index
    %c0_35 = arith.constant 0 : index
    %32 = vector.load %arg9[%c0_33, %c0_34, %c0_35] : memref<1x8x384xf32, #tpu.memory_space<vmem>>, vector<1x8x384xf32>
    %33 = vector.shape_cast %32 : vector<1x8x384xf32> to vector<8x384xf32>
    %34 = vector.shape_cast %31 : vector<8x384xf32> to vector<1x8x384xf32>
    tpu.vector_store %arg9[%c0_33, %c0_34, %c0_35], %34 {strides = array<i32>} : memref<1x8x384xf32, #tpu.memory_space<vmem>>, vector<1x8x384xf32>,
    return
  }
  func.func @transform_0(%arg0: i32) -> (i32, i32, i32) {
    %c0_i32 = arith.constant 0 : i32
    %c0_i32_0 = arith.constant 0 : i32
    %c0_i32_1 = arith.constant 0 : i32
    return %arg0, %c0_i32, %c0_i32_0 : i32, i32, i32
  }
  func.func @transform_1(%arg0: i32) -> (i32, i32, i32) {
    %c0_i32 = arith.constant 0 : i32
    %c0_i32_0 = arith.constant 0 : i32
    %c0_i32_1 = arith.constant 0 : i32
    return %arg0, %c0_i32, %c0_i32_0 : i32, i32, i32
  }
  func.func @transform_2(%arg0: i32) -> (i32, i32) {
    %c0_i32 = arith.constant 0 : i32
    %c0_i32_0 = arith.constant 0 : i32
    %c0_i32_1 = arith.constant 0 : i32
    return %c0_i32, %c0_i32_0 : i32, i32
  }
  func.func @transform_3(%arg0: i32) -> (i32, i32) {
    %c0_i32 = arith.constant 0 : i32
    %c0_i32_0 = arith.constant 0 : i32
    %c0_i32_1 = arith.constant 0 : i32
    return %c0_i32, %c0_i32_0 : i32, i32
  }
  func.func @transform_4(%arg0: i32) -> (i32, i32) {
    %c0_i32 = arith.constant 0 : i32
    %c0_i32_0 = arith.constant 0 : i32
    %c0_i32_1 = arith.constant 0 : i32
    return %c0_i32, %c0_i32_0 : i32, i32
  }
  func.func @transform_5(%arg0: i32) -> (i32, i32) {
    %c0_i32 = arith.constant 0 : i32
    %c0_i32_0 = arith.constant 0 : i32
    %c0_i32_1 = arith.constant 0 : i32
    return %c0_i32, %c0_i32_0 : i32, i32
  }
  func.func @transform_6(%arg0: i32) -> (i32, i32) {
    %c0_i32 = arith.constant 0 : i32
    %c0_i32_0 = arith.constant 0 : i32
    %c0_i32_1 = arith.constant 0 : i32
    return %c0_i32, %c0_i32_0 : i32, i32
  }
  func.func @transform_7(%arg0: i32) -> (i32, i32) {
    %c0_i32 = arith.constant 0 : i32
    %c0_i32_0 = arith.constant 0 : i32
    %c0_i32_1 = arith.constant 0 : i32
    return %c0_i32, %c0_i32_0 : i32, i32
  }
  func.func @transform_8(%arg0: i32) -> (i32, i32, i32) {
    %c0_i32 = arith.constant 0 : i32
    %c0_i32_0 = arith.constant 0 : i32
    %c0_i32_1 = arith.constant 0 : i32
    return %arg0, %c0_i32, %c0_i32_0 : i32, i32, i32
  }
}

</mosaic_0001>

<bundles_post_ra>
// kernel: parametric_up_forward.1
= control target key start
LH: loop header
LB: loop body
LE: loop exit
PB: predicated region body
PF: predicated region fallthrough
CT: control target
= control target key end

     0   :  { %s1258_s27 = smov 0   ;;  %s1445_s0 = inlined_call_operand.vmem [shape: f32[2,8,64], index: 0, kind: input, shape index: {}]   ;;  %s1446_s1 = inlined_call_operand.vmem [shape: f32[2,4,512], index: 1, kind: input, shape index: {}]   ;;  %s1447_s2 = inlined_call_operand.vmem [shape: f32[4,8], index: 2, kind: input, shape index: {}]   ;;  %s1448_s3 = inlined_call_operand.vmem [shape: f32[64,512], index: 3, kind: input, shape index: {}]   ;;  %s1449_s4 = inlined_call_operand.vmem [shape: f32[4,512], index: 4, kind: input, shape index: {}]   ;;  %s1450_s5 = inlined_call_operand.vmem [shape: f32[8,72], index: 5, kind: input, shape index: {}]   ;;  %s1451_s6 = inlined_call_operand.vmem [shape: f32[8,1], index: 6, kind: input, shape index: {}]   ;;  %s1452_s7 = inlined_call_operand.vmem [shape: f32[8,1], index: 7, kind: input, shape index: {}]   ;;  %s1453_s8 = inlined_call_operand.vmem [shape: f32[2,8,384], index: 8, kind: output, shape index: {}]  }
   0x1 LB: > { %s981_s28 = sadd.s32 4294967295, %s1199_s27   ;;  %p985_p0 = scmp.ge.s32.totalorder %s1199_s27, 1  ;;  %s1199_s27 = sphi %s1258_s27, %s18_s27  }
   0x2   : > { %p271_p1 = scmp.lt.s32.totalorder %s1199_s27, 3 }
   0x4   : > { %p272_p2 = pnand %p985_p0, %p271_p1 }
   0x5   : > { %p309_p3 = scmp.lt.s32.totalorder (!%p272_p2), %s981_s28, 1  ;;  %v1201_v0 = vmov (!%p272_p2), 0.0   ;;  %vm1202_vm0 = vmmov (!%p272_p2), 0   ;;  %v400_v1 = vld [vmem:[%s1448_s3 + $0x8] sm:$0xff] (!%p272_p2)  ;;  %v402_v3 = vld [vmem:[%s1448_s3 + $0x18] sm:$0xff] (!%p272_p2)  ;;  %v399_v6 = vld [vmem:[%s1448_s3] sm:$0xff] (!%p272_p2) }
   0x6   : > { %275 = sbr.rel (%p272_p2) target bundleno = 826 (0x33a), region = 52  ;;  %1010 = vmatprep.subr.mxu0 (!%p272_p2), %v1201_v0  ;;  %1012 = vmatprep.mubr.msk.f32.mxu0 (!%p272_p2), %vm1202_vm0, %v1201_v0  ;;  %v404_v2 = vld [vmem:[%s1448_s3 + $0x28] sm:$0xff] (!%p272_p2)  ;;  %v406_v5 = vld [vmem:[%s1448_s3 + $0x38] sm:$0xff] (!%p272_p2)  ;;  %v403_v7 = vld [vmem:[%s1448_s3 + $0x20] sm:$0xff] (!%p272_p2)  ;;  %vm325_vm1 = vcmask (!%p272_p2), 64512   ;;  %vm439_vm2 = vcmask (!%p272_p2), 523264  }
   0x7   : > { %v1036_v4 = vpack.c.bf16 (!%p272_p2), %v404_v2, %v400_v1  ;;  %507 = vmatprep.mubr.f32.mxu1 (!%p272_p2), %v1201_v0  ;;  %v323_v8 = vld [vmem:[%s1447_s2] sm:$0xf] (!%p272_p2)  ;;  %v1038_v9 = vpack.c.bf16 (!%p272_p2), %v403_v7, %v399_v6  ;;  %v401_v10 = vld [vmem:[%s1448_s3 + $0x10] sm:$0xff] (!%p272_p2)  ;;  %v408_v12 = vld [vmem:[%s1448_s3 + $0x48] sm:$0xff] (!%p272_p2)  ;;  %v1052_v13 = vpack.c.bf16 (!%p272_p2), %v406_v5, %v402_v3  ;;  %s1204_s25 = smov (!%p272_p2), 126   ;;  %s1205_s26 = smov (!%p272_p2), 127  }
   0x8   : > { %v405_v11 = vld [vmem:[%s1448_s3 + $0x30] sm:$0xff] (!%p272_p2)  ;;  %v412_v14 = vld [vmem:[%s1448_s3 + $0x68] sm:$0xff] (!%p272_p2)  ;;  %v410_v15 = vld [vmem:[%s1448_s3 + $0x58] sm:$0xff] (!%p272_p2)  ;;  %s1208_s9 = smov (!%p272_p2), 107   ;;  %s1209_s10 = smov (!%p272_p2), 87   ;;  %vm632_vm3 = vcmask (!%p272_p2), 1039360  }
   0x9   : > { %1037 = vmatprep.subr.bf16.mxu1 (!%p272_p2), %v1036_v4  ;;  %v414_v16 = vld [vmem:[%s1448_s3 + $0x78] sm:$0xff] (!%p272_p2)  ;;  %v1054_v17 = vpack.c.bf16 (!%p272_p2), %v405_v11, %v401_v10  ;;  %v1040_v18 = vpack.c.bf16 (!%p272_p2), %v412_v14, %v408_v12  ;;  %v407_v19 = vld [vmem:[%s1448_s3 + $0x40] sm:$0xff] (!%p272_p2)  ;;  %v409_v21 = vld [vmem:[%s1448_s3 + $0x50] sm:$0xff] (!%p272_p2)  ;;  %v1203_v10 = vmov (!%p272_p2), 0.0|0.0   ;;  %s1210_s11 = smov (!%p272_p2), 88   ;;  %s1212_s12 = smov (!%p272_p2), 86  }
   0xa   : > { %1039 = vmatpush1.bf16.msra.mxu1 (!%p272_p2), %v1038_v9  ;;  %v411_v20 = vld [vmem:[%s1448_s3 + $0x60] sm:$0xff] (!%p272_p2)  ;;  %v1056_v25 = vpack.c.bf16 (!%p272_p2), %v414_v16, %v410_v15  ;;  %v413_v29 = vld [vmem:[%s1448_s3 + $0x70] sm:$0xff] (!%p272_p2)  ;;  %v416_v30 = vld [vmem:[%s1448_s3 + $0x88] sm:$0xff] (!%p272_p2)  ;;  %vm662_vm4 = vcmask (!%p272_p2), 883712   ;;  %vm647_vm5 = vcmask (!%p272_p2), 1031168   ;;  %vm692_vm6 = vcmask (!%p272_p2), 867328  }
   0xb   : > { %v1042_v26 = vpack.c.bf16 (!%p272_p2), %v411_v20, %v407_v19  ;;  %1041 = vmatprep.subr.bf16.mxu1 (!%p272_p2), %v1040_v18  ;;  %v420_v31 = vld [vmem:[%s1448_s3 + $0xa8] sm:$0xff] (!%p272_p2)  ;;  %v418_v33 = vld [vmem:[%s1448_s3 + $0x98] sm:$0xff] (!%p272_p2)  ;;  %v415_v35 = vld [vmem:[%s1448_s3 + $0x80] sm:$0xff] (!%p272_p2)  ;;  %v1058_v36 = vpack.c.bf16 (!%p272_p2), %v413_v29, %v409_v21  ;;  %vm677_vm7 = vcmask (!%p272_p2), 875520   ;;  %vm722_vm8 = vcmask (!%p272_p2), 711680  }
   0xc   : > { %v1044_v32 = vpack.c.bf16 (!%p272_p2), %v420_v31, %v416_v30  ;;  %v422_v34 = vld [vmem:[%s1448_s3 + $0xb8] sm:$0xff] (!%p272_p2)  ;;  %v419_v37 = vld [vmem:[%s1448_s3 + $0xa0] sm:$0xff] (!%p272_p2)  ;;  %v417_v38 = vld [vmem:[%s1448_s3 + $0x90] sm:$0xff] (!%p272_p2)  ;;  %vm707_vm9 = vcmask (!%p272_p2), 719872   ;;  %vm737_vm10 = vcmask (!%p272_p2), 703488   ;;  %vm745_vm11 = vcmask (!%p272_p2), 588800  }
   0xd   : > { %s1455_s28 = smov (!%p309_p3, %s981_s28), 1  ;;  %v421_v39 = vld [vmem:[%s1448_s3 + $0xb0] sm:$0xff]  ;;  %v1060_v40 = vpack.c.bf16 %v422_v34, %v418_v33  ;;  %v1046_v41 = vpack.c.bf16 %v419_v37, %v415_v35  ;;  %v424_v42 = vld [vmem:[%s1448_s3 + $0xc8] sm:$0xff]  ;;  %v426_v44 = vld [vmem:[%s1448_s3 + $0xd8] sm:$0xff] }
   0xe   : > { %s986_s29 = sshll.u32 %s1455_s28, 3  ;;  %s997_s30 = sshll.u32 %s1455_s28, 4  ;;  %1043 = vmatpush1.bf16.msra.mxu1 %v1042_v26  ;;  %v428_v43 = vld [vmem:[%s1448_s3 + $0xe8] sm:$0xff]  ;;  %v430_v46 = vld [vmem:[%s1448_s3 + $0xf8] sm:$0xff]  ;;  %v423_v47 = vld [vmem:[%s1448_s3 + $0xc0] sm:$0xff]  ;;  %v1062_v49 = vpack.c.bf16 %v421_v39, %v417_v38 }
   0xf   : > { %s312_s17 = scalar_lea.vmem %s1445_s0, %s986_s29  ;;  %s317_s20 = scalar_lea.vmem %s1446_s1, %s997_s30  ;;  %1045 = vmatprep.subr.bf16.mxu1 %v1044_v32  ;;  %v1048_v45 = vpack.c.bf16 %v428_v43, %v424_v42  ;;  %v427_v48 = vld [vmem:[%s1448_s3 + $0xe0] sm:$0xff]  ;;  %v1064_v51 = vpack.c.bf16 %v430_v46, %v426_v44  ;;  %v425_v52 = vld [vmem:[%s1448_s3 + $0xd0] sm:$0xff]  ;;  %v432_v58 = vld [vmem:[%s1449_s4 + $0x8] sm:$0xff] }
  0x10   : > { %v324_v22 = vld [vmem:[%s312_s17] sm:$0xff]  ;;  %v586_v24 = vld [vmem:[%s317_s20 + $0x8] sm:$0xff]  ;;  %v1050_v50 = vpack.c.bf16 %v427_v48, %v423_v47  ;;  %v429_v53 = vld [vmem:[%s1448_s3 + $0xf0] sm:$0xff]  ;;  %v436_v60 = vcombine.high %v432_v58, %v432_v58  ;;  %s1206_s29 = smov 108   ;;  %s1207_s30 = smov 106  }
  0x11   : > { %v585_v23 = vld [vmem:[%s317_s20] sm:$0xff]  ;;  %1011 = vmatpush3.msra.mxu0 %v324_v22  ;;  %v590_v28 = vcombine.high %v586_v24, %v586_v24  ;;  %595 = vst [vmem:[#allocation2 + $0x10] sm:$0xf] %v586_v24  ;;  %v1066_v54 = vpack.c.bf16 %v429_v53, %v425_v52  ;;  %s1096_s19 = smul.u32 24, %s1455_s28 }
  0x12   : > { %v589_v27 = vcombine.high %v585_v23, %v585_v23  ;;  %593 = vst [vmem:[#allocation2] sm:$0xf] %v585_v23  ;;  %1013 = vmatmul.mubr.msk.f32.vlgmr.msra.gmra.mrb[0].mxu0 %vm325_vm1, %v323_v8  ;;  %1053 = vmatprep.subr.bf16.mxu0 %v1052_v13  ;;  %v431_v57 = vld [vmem:[%s1449_s4] sm:$0xff] }
  0x13   : > { %596 = vst [vmem:[#allocation2 + $0x18] sm:$0xf] %v590_v28  ;;  %1055 = vmatpush1.bf16.msra.mxu0 %v1054_v17  ;;  %578 = vmatprep.mubr.f32.mxu0 %v1201_v0  ;;  %v435_v59 = vcombine.high %v431_v57, %v431_v57  ;;  %v1211_v17 = vmov 0   ;;  %v890_v18 = vld [vmem:[%s1451_s6] sm:$0xff]  ;;  %s322_s22 = scalar_lea.vmem %s1453_s8, %s1096_s19 }
  0x14   : > { %594 = vst [vmem:[#allocation2 + $0x8] sm:$0xf] %v589_v27  ;;  %1057 = vmatprep.subr.bf16.mxu0 %v1056_v25  ;;  %1047 = vmatpush1.bf16.msra.mxu1 %v1046_v41  ;;  %v899_v19 = vld [vmem:[%s1452_s7] sm:$0xff] }
  0x15   : > { %1049 = vmatprep.subr.bf16.mxu1 %v1048_v45  ;;  %1187 = vset.pattern.permute.xlu0 %v1211_v17 }
  0x16   : > { %1188 = vset.pattern.permute.xlu1 %v1211_v17 }
  0x17   : > { %1059 = vmatpush1.bf16.msra.mxu0 %v1058_v36 }
  0x18   : > { %1061 = vmatprep.subr.bf16.mxu0 %v1060_v40  ;;  %1051 = vmatpush1.bf16.msra.mxu1 %v1050_v50 }
  0x1b   : > { %1063 = vmatpush1.bf16.msra.mxu0 %v1062_v49 }
  0x1c   : > { %1065 = vmatprep.subr.bf16.mxu0 %v1064_v51 }
  0x1f   : > { %1067 = vmatpush1.bf16.msra.mxu0 %v1066_v54 }
  0x20   : > { %1084 = vmatprep.subr.bf16.mxu0 %v1203_v10 }
  0xe5   : > { %v395_v55 = vpop.f32.mrb[0].mxu0 }
  0xe6   : > { %v1014_v56 = vpop.f32.mrb[1].mxu0  ;;  %991 = vmatmul.mubr.msk.f32.vlgmr.msra.gmra.mrb[0].mxu1 %vm439_vm2, %v395_v55  ;;  %992 = vmatmul.mubr.msk.f32.vlgmr.msra.gmra.mrb[2].mxu0 %vm439_vm2, %v395_v55 }
  0xe7   : > { %813 = vmatprep.mubr.f32.mxu1 %v1201_v0  ;;  %1033 = vmatprep.mubr.msk.f32.mxu0 %vm1202_vm0, %v1201_v0 }
 0x1b9   : > { %v509_v61 = vpop.f32.mrb[0].mxu1  ;;  %v580_v62 = vpop.f32.mrb[2].mxu0 }
 0x1ba   : > { %v510_v63 = vadd.f32 %v509_v61, %v431_v57  ;;  %v581_v1 = vadd.f32 %v580_v62, %v432_v58  ;;  %v511_v2 = vpop.f32.mrb[1].mxu1  ;;  %v582_v3 = vpop.f32.mrb[3].mxu0 }
 0x1bb   : > { %v512_v4 = vadd.f32 %v511_v2, %v435_v59  ;;  %v583_v5 = vadd.f32 %v582_v3, %v436_v60 }
 0x1bc   : > { %v601_v6 = vrot.slane %v510_v63, 4  ;;  %v603_v7 = vrot.slane %v581_v1, 4 }
 0x1bd   : > { %v602_v8 = vrot.slane %v512_v4, 4  ;;  %v604_v9 = vrot.slane %v583_v5, 4 }
 0x1be   : > { %609 = vst [vmem:[#allocation2] sm:$0xf0] %v601_v6  ;;  %611 = vst [vmem:[#allocation2 + $0x10] sm:$0xf0] %v603_v7 }
 0x1bf   : > { %610 = vst [vmem:[#allocation2 + $0x8] sm:$0xf0] %v602_v8  ;;  %612 = vst [vmem:[#allocation2 + $0x18] sm:$0xf0] %v604_v9 }
 0x1c5   : > { %v1391_v11 = vld [vmem:[#allocation2 + $0x10] sm:$0xff]  ;;  %v1394_v14 = vld [vmem:[#allocation2] sm:$0xff] }
 0x1c6   : > { %v617_v12 = vld [vmem:[#allocation2 + $0x8] sm:$0xff]  ;;  %v619_v15 = vld [vmem:[#allocation2 + $0x18] sm:$0xff] }
 0x1c7   : > { %v1127_v13 = vpack.i.bf16 %v1391_v11, %v617_v12  ;;  %v1122_v16 = vpack.i.bf16 %v619_v15, %v1394_v14 }
 0x1c9   : > { %1128 = vrot.lane.b32.xlu1 %v1127_v13, %s1204_s25  ;;  %1118 = vrot.lane.b32.xlu0 %v1127_v13, %s1205_s26 }
 0x1cd   : > { %1133 = vrot.lane.b32.xlu1 %v1127_v13, %s1206_s29  ;;  %1123 = vrot.lane.b32.xlu0 %v1122_v16, %s1205_s26 }
 0x1d1   : > { %1143 = vrot.lane.b32.xlu1 %v1122_v16, %s1206_s29  ;;  %1138 = vrot.lane.b32.xlu0 %v1122_v16, %s1204_s25 }
 0x1d5   : > { %1153 = vrot.lane.b32.xlu1 %v1127_v13, %s1207_s30  ;;  %1148 = vrot.lane.b32.xlu0 %v1127_v13, %s1208_s9 }
 0x1d9   : > { %1163 = vrot.lane.b32.xlu1 %v1122_v16, %s1207_s30  ;;  %1158 = vrot.lane.b32.xlu0 %v1122_v16, %s1208_s9 }
 0x1dd   : > { %1173 = vrot.lane.b32.xlu1 %v1127_v13, %s1209_s10  ;;  %1168 = vrot.lane.b32.xlu0 %v1127_v13, %s1210_s11 }
 0x1e1   : > { %1183 = vrot.lane.b32.xlu1 %v1122_v16, %s1209_s10  ;;  %1178 = vrot.lane.b32.xlu0 %v1122_v16, %s1210_s11 }
 0x1e5   : > { %733 = vrot.lane.b32.xlu1 %v1391_v11, %s1212_s12  ;;  %731 = vrot.lane.b32.xlu0 %v617_v12, %s1212_s12 }
 0x1e9   : > { %735 = vrot.lane.b32.xlu1 %v619_v15, %s1212_s12  ;;  %729 = vrot.lane.b32.xlu0 %v1394_v14, %s1212_s12 }
 0x1ed   : > { %893 = vperm.xlu0 %1187, %v890_v18   ;;  %902 = vperm.xlu1 %1188, %v899_v19  }
 0x23b   : > { %v1129_v20 = vpop.permute.xlu1 %1128  ;;  %v1119_v21 = vpop.permute.xlu0 %1118 }
 0x23c   : > { %v1121_v22 = vunpack.i.h.bf16 %v1119_v21  ;;  %v1120_v23 = vunpack.i.l.bf16 %v1119_v21  ;;  %v1131_v24 = vunpack.i.h.bf16 %v1129_v20  ;;  %v1130_v25 = vunpack.i.l.bf16 %v1129_v20 }
 0x23e   : > { %v634_v26 = vsel %vm632_vm3, %v1120_v23, %v1121_v22  ;;  %v649_v36 = vsel %vm647_vm5, %v1130_v25, %v1131_v24 }
 0x23f   : > { %v1134_v27 = vpop.permute.xlu1 %1133  ;;  %v1124_v28 = vpop.permute.xlu0 %1123  ;;  %v1068_v29 = vpack.c.bf16 %v634_v26, %v617_v12 }
 0x240   : > { %v1136_v30 = vunpack.i.h.bf16 %v1134_v27  ;;  %v1135_v31 = vunpack.i.l.bf16 %v1134_v27  ;;  %v1126_v32 = vunpack.i.h.bf16 %v1124_v28  ;;  %v1125_v33 = vunpack.i.l.bf16 %v1124_v28 }
 0x241   : > { %1069 = vmatprep.subr.bf16.mxu1 %v1068_v29 }
 0x242   : > { %v633_v34 = vsel %vm632_vm3, %v1125_v33, %v1120_v23  ;;  %v635_v35 = vsel %vm632_vm3, %v1121_v22, %v1126_v32  ;;  %v664_v37 = vsel %vm662_vm4, %v1135_v31, %v1136_v30 }
 0x243   : > { %v1070_v38 = vpack.c.bf16 %v633_v34, %v1394_v14  ;;  %v1085_v39 = vpack.c.bf16 %v635_v35, %v1391_v11  ;;  %v1144_v40 = vpop.permute.xlu1 %1143  ;;  %v1139_v41 = vpop.permute.xlu0 %1138  ;;  %v1072_v42 = vpack.c.bf16 %v664_v37, %v649_v36  ;;  %v744_v37 = vld [vmem:[%s1450_s5] sm:$0xff] }
 0x244   : > { %v1146_v43 = vunpack.i.h.bf16 %v1144_v40  ;;  %v1145_v44 = vunpack.i.l.bf16 %v1144_v40  ;;  %v1141_v45 = vunpack.i.h.bf16 %v1139_v41  ;;  %v1140_v46 = vunpack.i.l.bf16 %v1139_v41 }
 0x245   : > { %1071 = vmatpush1.bf16.msra.mxu1 %v1070_v38  ;;  %1086 = vmatpush3.bf16.msra.mxu0 %v1085_v39 }
 0x246   : > { %v663_v47 = vsel %vm662_vm4, %v1145_v44, %v1135_v31  ;;  %v665_v48 = vsel %vm662_vm4, %v1136_v30, %v1146_v43  ;;  %v650_v49 = vsel %vm647_vm5, %v1131_v24, %v1141_v45  ;;  %v648_v50 = vsel %vm647_vm5, %v1140_v46, %v1130_v25  ;;  %1073 = vmatprep.subr.bf16.mxu1 %v1072_v42 }
 0x247   : > { %v1088_v51 = vpack.c.bf16 %v665_v48, %v650_v49  ;;  %v1074_v52 = vpack.c.bf16 %v663_v47, %v648_v50  ;;  %v1154_v53 = vpop.permute.xlu1 %1153  ;;  %v1149_v54 = vpop.permute.xlu0 %1148  ;;  %1087 = vmatprep.subr.bf16.mxu0 %v1203_v10 }
 0x248   : > { %v1156_v55 = vunpack.i.h.bf16 %v1154_v53  ;;  %v1155_v56 = vunpack.i.l.bf16 %v1154_v53  ;;  %v1151_v57 = vunpack.i.h.bf16 %v1149_v54  ;;  %v1150_v58 = vunpack.i.l.bf16 %v1149_v54 }
 0x249   : > { %1075 = vmatpush1.bf16.msra.mxu1 %v1074_v52  ;;  %1089 = vmatpush3.bf16.msra.mxu0 %v1088_v51 }
 0x24a   : > { %v679_v59 = vsel %vm677_vm7, %v1150_v58, %v1151_v57  ;;  %v694_v60 = vsel %vm692_vm6, %v1155_v56, %v1156_v55  ;;  %1090 = vmatprep.subr.bf16.mxu0 %v1203_v10 }
 0x24b   : > { %v1164_v61 = vpop.permute.xlu1 %1163  ;;  %v1159_v62 = vpop.permute.xlu0 %1158  ;;  %v1076_v63 = vpack.c.bf16 %v694_v60, %v679_v59 }
 0x24c   : > { %v1166_v1 = vunpack.i.h.bf16 %v1164_v61  ;;  %v1165_v2 = vunpack.i.l.bf16 %v1164_v61  ;;  %v1161_v3 = vunpack.i.h.bf16 %v1159_v62  ;;  %v1160_v4 = vunpack.i.l.bf16 %v1159_v62 }
 0x24d   : > { %1077 = vmatprep.subr.bf16.mxu1 %v1076_v63 }
 0x24e   : > { %v693_v5 = vsel %vm692_vm6, %v1165_v2, %v1155_v56  ;;  %v695_v6 = vsel %vm692_vm6, %v1156_v55, %v1166_v1  ;;  %v678_v7 = vsel %vm677_vm7, %v1160_v4, %v1150_v58  ;;  %v680_v8 = vsel %vm677_vm7, %v1151_v57, %v1161_v3 }
 0x24f   : > { %v1078_v9 = vpack.c.bf16 %v693_v5, %v678_v7  ;;  %v1091_v11 = vpack.c.bf16 %v695_v6, %v680_v8  ;;  %v1174_v12 = vpop.permute.xlu1 %1173  ;;  %v1169_v13 = vpop.permute.xlu0 %1168 }
 0x250   : > { %v1176_v14 = vunpack.i.h.bf16 %v1174_v12  ;;  %v1175_v15 = vunpack.i.l.bf16 %v1174_v12  ;;  %v1171_v16 = vunpack.i.h.bf16 %v1169_v13  ;;  %v1170_v17 = vunpack.i.l.bf16 %v1169_v13 }
 0x251   : > { %1079 = vmatpush1.bf16.msra.mxu1 %v1078_v9  ;;  %1092 = vmatpush3.bf16.msra.mxu0 %v1091_v11 }
 0x252   : > { %v709_v18 = vsel %vm707_vm9, %v1170_v17, %v1171_v16  ;;  %v724_v19 = vsel %vm722_vm8, %v1175_v15, %v1176_v14  ;;  %1093 = vmatprep.subr.bf16.mxu0 %v1203_v10 }
 0x253   : > { %v1184_v20 = vpop.permute.xlu1 %1183  ;;  %v1179_v21 = vpop.permute.xlu0 %1178  ;;  %v1080_v22 = vpack.c.bf16 %v724_v19, %v709_v18 }
 0x254   : > { %v1186_v23 = vunpack.i.h.bf16 %v1184_v20  ;;  %v1185_v24 = vunpack.i.l.bf16 %v1184_v20  ;;  %v1181_v25 = vunpack.i.h.bf16 %v1179_v21  ;;  %v1180_v26 = vunpack.i.l.bf16 %v1179_v21 }
 0x255   : > { %1081 = vmatprep.subr.bf16.mxu1 %v1080_v22 }
 0x256   : > { %v723_v27 = vsel %vm722_vm8, %v1185_v24, %v1175_v15  ;;  %v725_v28 = vsel %vm722_vm8, %v1176_v14, %v1186_v23  ;;  %v708_v29 = vsel %vm707_vm9, %v1180_v26, %v1170_v17  ;;  %v710_v30 = vsel %vm707_vm9, %v1171_v16, %v1181_v25 }
 0x257   : > { %v1082_v31 = vpack.c.bf16 %v723_v27, %v708_v29  ;;  %v1094_v32 = vpack.c.bf16 %v725_v28, %v710_v30  ;;  %v734_v10 = vpop.permute.xlu1 %733  ;;  %v732_v33 = vpop.permute.xlu0 %731 }
 0x258   : > { %v739_v34 = vsel %vm737_vm10, %v732_v33, %v734_v10 }
 0x259   : > { %1083 = vmatpush1.bf16.msra.mxu1 %v1082_v31  ;;  %1095 = vmatpush3.bf16.msra.mxu0 %v1094_v32 }
 0x25a   : > { %765 = vmatprep.subr.mxu1 %v739_v34  ;;  %1031 = vmatprep.subr.mxu0 %v1201_v0 }
 0x25b   : > { %v736_v35 = vpop.permute.xlu1 %735  ;;  %v730_v36 = vpop.permute.xlu0 %729 }
 0x25c   : > { %v740_v38 = vsel %vm737_vm10, %v734_v10, %v736_v35  ;;  %v738_v39 = vsel %vm737_vm10, %v730_v36, %v732_v33 }
 0x25d   : > { %766 = vmatpush1.msra.mxu1 %v738_v39  ;;  %1032 = vmatpush3.msra.mxu0 %v740_v38 }
 0x25e   : > { %993 = vmatmul.mubr.msk.f32.vlgmr.msra.gmra.mrb[2].mxu1 %vm745_vm11, %v744_v37  ;;  %1034 = vmatmul.mubr.msk.f32.vlgmr.msra.gmra.mrb[4].mxu0 %vm745_vm11, %v744_v37 }
 0x26c   : > { %v894_v40 = vpop.permute.xlu0 %893  ;;  %v903_v41 = vpop.permute.xlu1 %902 }
 0x331   : > { %v815_v42 = vpop.f32.mrb[2].mxu1  ;;  %v886_v43 = vpop.f32.mrb[4].mxu0 }
 0x332   : > { %v896_v0 = vmul.f32 %v894_v40, %v815_v42  ;;  %v898_v44 = vmul.f32 %v894_v40, %v886_v43  ;;  %v817_v45 = vpop.f32.mrb[3].mxu1  ;;  %v1035_v46 = vpop.f32.mrb[5].mxu0 }
 0x333   : > { %v897_v47 = vmul.f32 %v894_v40, %v817_v45 }
 0x334   : > { %v905_v48 = vadd.f32 %v903_v41, %v896_v0  ;;  %v907_v49 = vadd.f32 %v903_v41, %v898_v44 }
 0x335   : > { %v906_v50 = vadd.f32 %v903_v41, %v897_v47 }
 0x336   : > { %v908_v51 = vmax.f32 %v905_v48, 0.0  ;;  %v910_v52 = vmax.f32 %v907_v49, 0.0 }
 0x337   : > { %v909_v53 = vmax.f32 %v906_v50, 0.0 }
 0x338   : > { %911 = vst [vmem:[%s322_s22] sm:$0xff] %v908_v51  ;;  %913 = vst [vmem:[%s322_s22 + $0x10] sm:$0xff] %v910_v52 }
 0x339   : > { %912 = vst [vmem:[%s322_s22 + $0x8] sm:$0xff] %v909_v53 }
 0x33a PF: > { %s18_s27 = sadd.s32 1, %s1199_s27  }
 0x33b   : > { %p15_p4 = scmp.ge.s32.totalorder %s18_s27, 4  }
 0x33d   :  { %17 = sbr.rel (!%p15_p4) target bundleno = 1 (0x1), region = 85 }

</bundles_post_ra>
